<compile_context>
chip_gen: v5e
topology: v5e:2x2
jax: 0.10.0
libtpu: 0.0.40
codegen_flags: <defaults>
</compile_context>

<pallas_src>
import functools

import jax
import jax.numpy as jnp
from jax import lax
from jax.experimental import pallas as pl
from jax.experimental.pallas import tpu as pltpu


def _round_up(x, m):
    return ((x + m - 1) // m) * m


def _grn_reduce_kernel(f_ref, bidx_ref, nx_ref, *, num_batches, b_pad, real_c):
    """Accumulate per-batch sum-of-squares; finalize Nx at the last grid step."""
    i = pl.program_id(0)

    @pl.when(i == 0)
    def _():
        nx_ref[...] = jnp.zeros_like(nx_ref)

    f = f_ref[...].astype(jnp.float32)            # (TILE_N, C_pad)
    bidx = bidx_ref[...]                          # (TILE_N, 1) int32
    sq = f * f

    # Per-batch masked sublane reductions (B is small & static -> unrolled on
    # the VPU/XLU; avoids materializing a one-hot and any MXU transpose).
    b_pad_c = nx_ref.shape
    partial = jnp.zeros(b_pad_c, jnp.float32)     # (B_pad, C_pad)
    row_ids = lax.broadcasted_iota(jnp.int32, b_pad_c, 0)
    for b in range(num_batches):
        masked = jnp.where(bidx == b, sq, 0.0)                  # (TILE_N, C_pad)
        row = jnp.sum(masked, axis=0, keepdims=True)            # (1, C_pad)
        partial = jnp.where(row_ids == b, row, partial)         # place row b

    nx_ref[...] += partial

    @pl.when(i == pl.num_programs(0) - 1)
    def _():
        sos = nx_ref[...]
        gx = jnp.sqrt(sos)
        # Padded channels carry zero SOS -> zero Gx, so summing over all lanes
        # equals the sum over the real channels; divide by the real C.
        mean = jnp.sum(gx, axis=-1, keepdims=True) * (1.0 / real_c)
        nx_ref[...] = gx / (mean + 1e-6)


def _grn_apply_kernel(f_ref, bidx_ref, nx_ref, gamma_ref, beta_ref, out_ref, *,
                      num_batches):
    """out = F * (1 + gamma * Nx[bidx]) + beta   (one N-tile)."""
    f = f_ref[...].astype(jnp.float32)            # (TILE_N, C_pad)
    bidx = bidx_ref[...]                          # (TILE_N, 1) int32
    nx = nx_ref[...]                              # (B_pad, C_pad) f32

    # Gather Nx per point with B broadcast-selects on the VPU (B << MXU depth).
    nx_pp = jnp.zeros_like(f)
    for b in range(num_batches):
        nx_pp = jnp.where(bidx == b, nx[b:b + 1, :], nx_pp)

    gamma = gamma_ref[...]                        # (1, C_pad), broadcasts over rows
    beta = beta_ref[...]
    out = f * (1.0 + gamma * nx_pp) + beta        # saves one multiply vs f + g*(f*nx)
    out_ref[...] = out.astype(out_ref.dtype)


def minkowski_grn(feats, batch_idx, gamma, beta, num_batches, *, tile_n=None):
    """feats: (N, C) float, batch_idx: (N,) int32, gamma/beta: (1, C)."""
    n, c = feats.shape
    num_batches = int(num_batches)

    c_pad = _round_up(c, 128)                     # lane-dense layout
    b_pad = _round_up(max(num_batches, 1), 8)

    if tile_n is None:
        # ~1 MiB of f32 per tile; fits every generation's default scoped VMEM
        # with 2x double-buffered in+out tiles and leaves headroom on v7x.
        rows_per_mib = max(8, (((1 << 20) // (c_pad * 4)) // 8) * 8)
        tile_n = min(_round_up(n, 8), rows_per_mib, 2048)
    tile_n = max(8, _round_up(tile_n, 8))

    n_pad = _round_up(n, tile_n)
    num_tiles = n_pad // tile_n

    f32 = jnp.float32
    feats_p = jnp.zeros((n_pad, c_pad), f32).at[:n, :c].set(feats.astype(f32))
    bidx_p = jnp.zeros((n_pad, 1), jnp.int32).at[:n, 0].set(
        batch_idx.astype(jnp.int32))
    gamma_p = jnp.zeros((1, c_pad), f32).at[:, :c].set(
        gamma.reshape(1, c).astype(f32))
    beta_p = jnp.zeros((1, c_pad), f32).at[:, :c].set(
        beta.reshape(1, c).astype(f32))

    vmem_limit = 32 * 1024 * 1024   # <= physical VMEM on v5e/v6e/v7x

    # ---- Pass 1: tiled segment reduction -> Nx (B_pad, C_pad) ----------------
    reduce_kernel = functools.partial(
        _grn_reduce_kernel, num_batches=num_batches, b_pad=b_pad, real_c=c)
    nx = pl.pallas_call(
        reduce_kernel,
        out_shape=jax.ShapeDtypeStruct((b_pad, c_pad), f32),
        grid=(num_tiles,),
        in_specs=[
            pl.BlockSpec((tile_n, c_pad), lambda i: (i, 0)),
            pl.BlockSpec((tile_n, 1), lambda i: (i, 0)),
        ],
        out_specs=pl.BlockSpec((b_pad, c_pad), lambda i: (0, 0)),
        compiler_params=pltpu.CompilerParams(
            dimension_semantics=("arbitrary",),
            vmem_limit_bytes=vmem_limit,
        ),
    )(feats_p, bidx_p)

    # ---- Pass 2: tiled elementwise apply -------------------------------------
    apply_kernel = functools.partial(_grn_apply_kernel, num_batches=num_batches)
    out_p = pl.pallas_call(
        apply_kernel,
        out_shape=jax.ShapeDtypeStruct((n_pad, c_pad), feats.dtype),
        grid=(num_tiles,),
        in_specs=[
            pl.BlockSpec((tile_n, c_pad), lambda i: (i, 0)),
            pl.BlockSpec((tile_n, 1), lambda i: (i, 0)),
            pl.BlockSpec((b_pad, c_pad), lambda i: (0, 0)),
            pl.BlockSpec((1, c_pad), lambda i: (0, 0)),
            pl.BlockSpec((1, c_pad), lambda i: (0, 0)),
        ],
        out_specs=pl.BlockSpec((tile_n, c_pad), lambda i: (i, 0)),
        compiler_params=pltpu.CompilerParams(
            dimension_semantics=("parallel",),
            vmem_limit_bytes=vmem_limit,
        ),
    )(feats_p, bidx_p, nx, gamma_p, beta_p)

    return out_p[:n, :c]


def _reference(feats, batch_idx, gamma, beta, num_batches):
    sos = jax.ops.segment_sum(feats * feats, batch_idx, num_segments=num_batches)
    gx = jnp.sqrt(sos)
    nx = gx / (jnp.mean(gx, axis=-1, keepdims=True) + 1e-6)
    return feats + gamma * (feats * nx[batch_idx]) + beta


if __name__ == "__main__":
    key = jax.random.PRNGKey(0)
    k_feat, k_bidx, k_gamma, k_beta = jax.random.split(key, 4)

    num_points = 96      # N: sparse points (x.F rows)
    dim = 32             # C: channel dim of the GRN
    num_batches = 4      # B: distinct batch indices in x.C[:, 0]

    feats = jax.random.normal(k_feat, (num_points, dim), dtype=jnp.float32)
    batch_idx = jax.random.randint(k_bidx, (num_points,), 0, num_batches,
                                   dtype=jnp.int32)
    # Module __init__ uses zeros; use small random values so the elementwise
    # path is actually exercised (deterministic from PRNGKey(0)).
    gamma = 0.1 * jax.random.normal(k_gamma, (1, dim), dtype=jnp.float32)
    beta = 0.1 * jax.random.normal(k_beta, (1, dim), dtype=jnp.float32)

    # Small tile override so the multi-tile accumulate / finalize path runs.
    out = minkowski_grn(feats, batch_idx, gamma, beta, num_batches, tile_n=32)
    out = jax.block_until_ready(out)

    ref = _reference(feats, batch_idx, gamma, beta, num_batches)
    assert out.shape == ref.shape and out.dtype == ref.dtype
    assert jnp.allclose(out, ref, atol=1e-4, rtol=1e-4), "mismatch vs reference"

    # Also exercise the default (auto) tiling path.
    out2 = jax.block_until_ready(
        minkowski_grn(feats, batch_idx, gamma, beta, num_batches))
    assert jnp.allclose(out2, ref, atol=1e-4, rtol=1e-4), "mismatch (auto tile)"

    print("KERNEL_OK")
</pallas_src>

<mosaic_0001>
module attributes {stable_mosaic.version = 11 : i64} {
  func.func @_grn_reduce_kernel(%arg0: i32, %arg1: memref<32x128xf32, #tpu.memory_space<vmem>>, %arg2: memref<32x1xi32, #tpu.memory_space<vmem>>, %arg3: memref<8x128xf32, #tpu.memory_space<vmem>>) attributes {dimension_semantics = [#tpu.dimension_semantics<arbitrary>], iteration_bounds = array<i64: 3>, scalar_prefetch = 0 : i64, scratch_operands = 0 : i64, tpu.core_type = #tpu.core_type<tc>, window_params = [{transform_indices = @transform_0, window_bounds = array<i64: 32, 128>}, {transform_indices = @transform_1, window_bounds = array<i64: 32, 1>}, {pipeline_mode = #tpu.pipeline_mode<synchronous>, transform_indices = @transform_2, window_bounds = array<i64: 8, 128>}]} {
    %c0_i32 = arith.constant 0 : i32
    %0 = arith.cmpi eq, %arg0, %c0_i32 : i32
    %1 = arith.extui %0 : i1 to i32
    %c0_i32_0 = arith.constant 0 : i32
    %2 = arith.cmpi ne, %1, %c0_i32_0 : i32
    scf.if %2 {
      %cst_23 = arith.constant 0.000000e+00 : f32
      %66 = vector.broadcast %cst_23 : f32 to vector<8x128xf32>
      %c0_24 = arith.constant 0 : index
      %c0_25 = arith.constant 0 : index
      %67 = vector.load %arg3[%c0_24, %c0_25] : memref<8x128xf32, #tpu.memory_space<vmem>>, vector<8x128xf32>
      tpu.vector_store %arg3[%c0_24, %c0_25], %66 {strides = array<i32>} : memref<8x128xf32, #tpu.memory_space<vmem>>, vector<8x128xf32>,
    } else {
    }
    %c0 = arith.constant 0 : index
    %c0_1 = arith.constant 0 : index
    %3 = vector.load %arg1[%c0, %c0_1] : memref<32x128xf32, #tpu.memory_space<vmem>>, vector<32x128xf32>
    %c0_2 = arith.constant 0 : index
    %c0_3 = arith.constant 0 : index
    %4 = vector.load %arg2[%c0_2, %c0_3] : memref<32x1xi32, #tpu.memory_space<vmem>>, vector<32x1xi32>
    %5 = arith.mulf %3, %3 : vector<32x128xf32>
    %cst = arith.constant 0.000000e+00 : f32
    %6 = vector.broadcast %cst : f32 to vector<8x128xf32>
    %7 = tpu.iota {dimensions = array<i32: 0>} : vector<8x128xi32>
    %c0_i32_4 = arith.constant 0 : i32
    %8 = vector.broadcast %c0_i32_4 : i32 to vector<32x1xi32>
    %9 = arith.cmpi eq, %4, %8 : vector<32x1xi32>
    %cst_5 = arith.constant 0.000000e+00 : f32
    %10 = vector.shape_cast %9 : vector<32x1xi1> to vector<32x1xi1>
    %11 = vector.broadcast %10 : vector<32x1xi1> to vector<32x128xi1>
    %12 = vector.broadcast %cst_5 : f32 to vector<32x128xf32>
    %13 = arith.select %11, %5, %12 : vector<32x128xi1>, vector<32x128xf32>
    %cst_6 = arith.constant dense<0.000000e+00> : vector<128xf32>
    %14 = vector.multi_reduction <add>, %13, %cst_6 [0] : vector<32x128xf32> to vector<128xf32>
    %15 = vector.shape_cast %14 : vector<128xf32> to vector<1x128xf32>
    %c0_i32_7 = arith.constant 0 : i32
    %16 = vector.broadcast %c0_i32_7 : i32 to vector<8x128xi32>
    %17 = arith.cmpi eq, %7, %16 : vector<8x128xi32>
    %18 = vector.shape_cast %15 : vector<1x128xf32> to vector<1x128xf32>
    %19 = vector.broadcast %18 : vector<1x128xf32> to vector<8x128xf32>
    %20 = arith.select %17, %19, %6 : vector<8x128xi1>, vector<8x128xf32>
    %c1_i32 = arith.constant 1 : i32
    %21 = vector.broadcast %c1_i32 : i32 to vector<32x1xi32>
    %22 = arith.cmpi eq, %4, %21 : vector<32x1xi32>
    %cst_8 = arith.constant 0.000000e+00 : f32
    %23 = vector.shape_cast %22 : vector<32x1xi1> to vector<32x1xi1>
    %24 = vector.broadcast %23 : vector<32x1xi1> to vector<32x128xi1>
    %25 = vector.broadcast %cst_8 : f32 to vector<32x128xf32>
    %26 = arith.select %24, %5, %25 : vector<32x128xi1>, vector<32x128xf32>
    %cst_9 = arith.constant dense<0.000000e+00> : vector<128xf32>
    %27 = vector.multi_reduction <add>, %26, %cst_9 [0] : vector<32x128xf32> to vector<128xf32>
    %28 = vector.shape_cast %27 : vector<128xf32> to vector<1x128xf32>
    %c1_i32_10 = arith.constant 1 : i32
    %29 = vector.broadcast %c1_i32_10 : i32 to vector<8x128xi32>
    %30 = arith.cmpi eq, %7, %29 : vector<8x128xi32>
    %31 = vector.shape_cast %28 : vector<1x128xf32> to vector<1x128xf32>
    %32 = vector.broadcast %31 : vector<1x128xf32> to vector<8x128xf32>
    %33 = arith.select %30, %32, %20 : vector<8x128xi1>, vector<8x128xf32>
    %c2_i32 = arith.constant 2 : i32
    %34 = vector.broadcast %c2_i32 : i32 to vector<32x1xi32>
    %35 = arith.cmpi eq, %4, %34 : vector<32x1xi32>
    %cst_11 = arith.constant 0.000000e+00 : f32
    %36 = vector.shape_cast %35 : vector<32x1xi1> to vector<32x1xi1>
    %37 = vector.broadcast %36 : vector<32x1xi1> to vector<32x128xi1>
    %38 = vector.broadcast %cst_11 : f32 to vector<32x128xf32>
    %39 = arith.select %37, %5, %38 : vector<32x128xi1>, vector<32x128xf32>
    %cst_12 = arith.constant dense<0.000000e+00> : vector<128xf32>
    %40 = vector.multi_reduction <add>, %39, %cst_12 [0] : vector<32x128xf32> to vector<128xf32>
    %41 = vector.shape_cast %40 : vector<128xf32> to vector<1x128xf32>
    %c2_i32_13 = arith.constant 2 : i32
    %42 = vector.broadcast %c2_i32_13 : i32 to vector<8x128xi32>
    %43 = arith.cmpi eq, %7, %42 : vector<8x128xi32>
    %44 = vector.shape_cast %41 : vector<1x128xf32> to vector<1x128xf32>
    %45 = vector.broadcast %44 : vector<1x128xf32> to vector<8x128xf32>
    %46 = arith.select %43, %45, %33 : vector<8x128xi1>, vector<8x128xf32>
    %c3_i32 = arith.constant 3 : i32
    %47 = vector.broadcast %c3_i32 : i32 to vector<32x1xi32>
    %48 = arith.cmpi eq, %4, %47 : vector<32x1xi32>
    %cst_14 = arith.constant 0.000000e+00 : f32
    %49 = vector.shape_cast %48 : vector<32x1xi1> to vector<32x1xi1>
    %50 = vector.broadcast %49 : vector<32x1xi1> to vector<32x128xi1>
    %51 = vector.broadcast %cst_14 : f32 to vector<32x128xf32>
    %52 = arith.select %50, %5, %51 : vector<32x128xi1>, vector<32x128xf32>
    %cst_15 = arith.constant dense<0.000000e+00> : vector<128xf32>
    %53 = vector.multi_reduction <add>, %52, %cst_15 [0] : vector<32x128xf32> to vector<128xf32>
    %54 = vector.shape_cast %53 : vector<128xf32> to vector<1x128xf32>
    %c3_i32_16 = arith.constant 3 : i32
    %55 = vector.broadcast %c3_i32_16 : i32 to vector<8x128xi32>
    %56 = arith.cmpi eq, %7, %55 : vector<8x128xi32>
    %57 = vector.shape_cast %54 : vector<1x128xf32> to vector<1x128xf32>
    %58 = vector.broadcast %57 : vector<1x128xf32> to vector<8x128xf32>
    %59 = arith.select %56, %58, %46 : vector<8x128xi1>, vector<8x128xf32>
    %c0_17 = arith.constant 0 : index
    %c0_18 = arith.constant 0 : index
    %60 = vector.load %arg3[%c0_17, %c0_18] : memref<8x128xf32, #tpu.memory_space<vmem>>, vector<8x128xf32>
    %61 = arith.addf %60, %59 : vector<8x128xf32>
    %c0_19 = arith.constant 0 : index
    %c0_20 = arith.constant 0 : index
    %62 = vector.load %arg3[%c0_19, %c0_20] : memref<8x128xf32, #tpu.memory_space<vmem>>, vector<8x128xf32>
    tpu.vector_store %arg3[%c0_19, %c0_20], %61 {strides = array<i32>} : memref<8x128xf32, #tpu.memory_space<vmem>>, vector<8x128xf32>,
    %c2_i32_21 = arith.constant 2 : i32
    %63 = arith.cmpi eq, %arg0, %c2_i32_21 : i32
    %64 = arith.extui %63 : i1 to i32
    %c0_i32_22 = arith.constant 0 : i32
    %65 = arith.cmpi ne, %64, %c0_i32_22 : i32
    scf.if %65 {
      %c0_23 = arith.constant 0 : index
      %c0_24 = arith.constant 0 : index
      %66 = vector.load %arg3[%c0_23, %c0_24] : memref<8x128xf32, #tpu.memory_space<vmem>>, vector<8x128xf32>
      %67 = math.sqrt %66 : vector<8x128xf32>
      %cst_25 = arith.constant dense<0.000000e+00> : vector<8xf32>
      %68 = vector.multi_reduction <add>, %67, %cst_25 [1] : vector<8x128xf32> to vector<8xf32>
      %69 = vector.shape_cast %68 : vector<8xf32> to vector<8x1xf32>
      %cst_26 = arith.constant 3.125000e-02 : f32
      %70 = vector.broadcast %cst_26 : f32 to vector<8x1xf32>
      %71 = arith.mulf %69, %70 : vector<8x1xf32>
      %cst_27 = arith.constant 9.99999997E-7 : f32
      %72 = vector.broadcast %cst_27 : f32 to vector<8x1xf32>
      %73 = arith.addf %71, %72 : vector<8x1xf32>
      %74 = vector.broadcast %73 : vector<8x1xf32> to vector<8x128xf32>
      %75 = arith.divf %67, %74 : vector<8x128xf32>
      %c0_28 = arith.constant 0 : index
      %c0_29 = arith.constant 0 : index
      %76 = vector.load %arg3[%c0_28, %c0_29] : memref<8x128xf32, #tpu.memory_space<vmem>>, vector<8x128xf32>
      tpu.vector_store %arg3[%c0_28, %c0_29], %75 {strides = array<i32>} : memref<8x128xf32, #tpu.memory_space<vmem>>, vector<8x128xf32>,
    } else {
    }
    return
  }
  func.func @transform_0(%arg0: i32) -> (i32, i32) {
    %c0_i32 = arith.constant 0 : i32
    %c0_i32_0 = arith.constant 0 : i32
    return %arg0, %c0_i32 : i32, i32
  }
  func.func @transform_1(%arg0: i32) -> (i32, i32) {
    %c0_i32 = arith.constant 0 : i32
    %c0_i32_0 = arith.constant 0 : i32
    return %arg0, %c0_i32 : i32, i32
  }
  func.func @transform_2(%arg0: i32) -> (i32, i32) {
    %c0_i32 = arith.constant 0 : i32
    %c0_i32_0 = arith.constant 0 : i32
    %c0_i32_1 = arith.constant 0 : i32
    return %c0_i32, %c0_i32_0 : i32, i32
  }
}

</mosaic_0001>

<bundles_post_ra>
// kernel: tpu_custom_call.1
= control target key start
LH: loop header
LB: loop body
LE: loop exit
PB: predicated region body
PF: predicated region fallthrough
CT: control target
= control target key end

     0   :  { %7 = vsyncpa [#allocation3], 0  ;;  %s525_s9 = smov 0   ;;  %s557_s0 = inlined_call_operand.vmem [shape: f32[96,128], index: 0, kind: input, shape index: {}]   ;;  %s558_s1 = inlined_call_operand.vmem [shape: s32[96,1], index: 1, kind: input, shape index: {}]   ;;  %s559_s2 = inlined_call_operand.hbm [shape: f32[8,128], index: 2, kind: output, shape index: {}]  }
   0x1 LB: > { %s531_s10 = sadd.s32 4294967295, %s505_s9   ;;  %p432_p0 = scmp.ge.s32.totalorder %s505_s9, 1  ;;  %s505_s9 = sphi %s525_s9, %s13_s9  }
   0x2   : > { %p120_p1 = scmp.lt.s32.totalorder %s505_s9, 4 }
   0x4   : > { %p121_p2 = pnand %p432_p0, %p120_p1 }
   0x5   : > { %s433_s11 = sshll.u32 (!%p121_p2), %s531_s10, 2  ;;  %p437_p4 = scmp.ne.s32.totalorder (!%p121_p2), %s531_s10, 0 }
   0x6   : > { %124 = sbr.rel (%p121_p2) target bundleno = 370 (0x172), region = 28  ;;  %p143_p3 = scmp.lt.s32.totalorder (!%p121_p2), %s433_s11, 11 }
   0xb   : > { %s561_s11 = smov (!%p143_p3, %s433_s11), 11  ;;  %157 = sbr.rel (%p437_p4) target bundleno = 18 (0x12), region = 32 }
   0xc   : > { %s434_s12 = sshll.u32 %s561_s11, 3 }
   0xd   : > { %s539_s15 = scalar_lea.vmem %s557_s0, %s434_s12  ;;  %s152_s18 = scalar_lea.vmem %s558_s1, %s434_s12 }
  0x10   : > { %v507_v0 = vmov 0.0  }
  0x11   : > { %158 = vst [vmem:[#allocation2] sm:$0xff] %v507_v0 }
  0x12 PF: > { %v165_v1 = vld [vmem:[%s152_s18 + $0x10] sm:$0xff]  ;;  %v163_v2 = vld [vmem:[%s152_s18] sm:$0xff]  ;;  %v508_v3 = vmov 0   ;;  %v166_v7 = vld [vmem:[%s152_s18 + $0x18] sm:$0xff]  ;;  %p438_p5 = scmp.ne.s32.totalorder %s531_s10, 2 }
  0x13   : > { %462 = vset.pattern.permute.xlu2 %v508_v3  ;;  %461 = vset.pattern.permute.xlu1 %v508_v3  ;;  %vm175_vm0 = vcmp.eq.s32.totalorder %v165_v1, 0  ;;  %vm212_vm1 = vcmp.eq.s32.totalorder %v163_v2, 1  ;;  %vm173_vm2 = vcmp.eq.s32.totalorder %v163_v2, 0  ;;  %v164_v8 = vld [vmem:[%s152_s18 + $0x8] sm:$0xff]  ;;  %vm176_vm3 = vcmp.eq.s32.totalorder %v166_v7, 0  ;;  %v159_v28 = vld [vmem:[%s539_s15] sm:$0xff] }
  0x14   : > { %460 = vset.pattern.permute.xlu0 %v508_v3  ;;  %v179_v4 = vsel %vm175_vm0, 1, %v508_v3  ;;  %v216_v5 = vsel %vm212_vm1, 1, %v508_v3  ;;  %v177_v6 = vsel %vm173_vm2, 1, %v508_v3  ;;  %vm213_vm4 = vcmp.eq.s32.totalorder %v164_v8, 1  ;;  %v160_v29 = vld [vmem:[%s539_s15 + $0x8] sm:$0xff]  ;;  %v161_v33 = vld [vmem:[%s539_s15 + $0x10] sm:$0xff] }
  0x15   : > { %188 = vperm.xlu1 %461, %v179_v4   ;;  %221 = vperm.xlu2 %462, %v216_v5   ;;  %vm174_vm5 = vcmp.eq.s32.totalorder %v164_v8, 0  ;;  %v180_v9 = vsel %vm176_vm3, 1, %v508_v3  ;;  %v217_v10 = vsel %vm213_vm4, 1, %v508_v3  ;;  %vm252_vm6 = vcmp.eq.s32.totalorder %v164_v8, 2  ;;  %v162_v39 = vld [vmem:[%s539_s15 + $0x18] sm:$0xff] }
  0x16   : > { %182 = vperm.xlu0 %460, %v177_v6   ;;  %v178_v11 = vsel %vm174_vm5, 1, %v508_v3  ;;  %vm214_vm7 = vcmp.eq.s32.totalorder %v165_v1, 1  ;;  %vm251_vm8 = vcmp.eq.s32.totalorder %v163_v2, 2  ;;  %v256_v12 = vsel %vm252_vm6, 1, %v508_v3 }
  0x17   : > { %v218_v13 = vsel %vm214_vm7, 1, %v508_v3  ;;  %v255_v14 = vsel %vm251_vm8, 1, %v508_v3  ;;  %vm291_vm9 = vcmp.eq.s32.totalorder %v164_v8, 3  ;;  %vm253_vm10 = vcmp.eq.s32.totalorder %v165_v1, 2 }
  0x18   : > { %vm290_vm11 = vcmp.eq.s32.totalorder %v163_v2, 3  ;;  %v295_v15 = vsel %vm291_vm9, 1, %v508_v3  ;;  %v257_v16 = vsel %vm253_vm10, 1, %v508_v3  ;;  %vm292_vm12 = vcmp.eq.s32.totalorder %v165_v1, 3 }
  0x19   : > { %v294_v17 = vsel %vm290_vm11, 1, %v508_v3  ;;  %vm254_vm13 = vcmp.eq.s32.totalorder %v166_v7, 2  ;;  %vm215_vm14 = vcmp.eq.s32.totalorder %v166_v7, 1  ;;  %v296_v18 = vsel %vm292_vm12, 1, %v508_v3 }
  0x1a   : > { %v258_v19 = vsel %vm254_vm13, 1, %v508_v3  ;;  %v219_v20 = vsel %vm215_vm14, 1, %v508_v3  ;;  %vm293_vm15 = vcmp.eq.s32.totalorder %v166_v7, 3  ;;  %v167_v31 = vmul.f32 %v159_v28, %v159_v28 }
  0x1b   : > { %v297_v21 = vsel %vm293_vm15, 1, %v508_v3  ;;  %v168_v32 = vmul.f32 %v160_v29, %v160_v29  ;;  %v169_v36 = vmul.f32 %v161_v33, %v161_v33  ;;  %v170_v43 = vmul.f32 %v162_v39, %v162_v39 }
  0x1d   : > { %191 = vperm.xlu1 %461, %v180_v9   ;;  %224 = vperm.xlu2 %462, %v217_v10  }
  0x1e   : > { %185 = vperm.xlu0 %460, %v178_v11  }
  0x25   : > { %263 = vperm.xlu1 %461, %v256_v12   ;;  %227 = vperm.xlu2 %462, %v218_v13  }
  0x26   : > { %260 = vperm.xlu0 %460, %v255_v14  }
  0x2d   : > { %302 = vperm.xlu1 %461, %v295_v15   ;;  %266 = vperm.xlu2 %462, %v257_v16   ;;  %v171_v15 = vlaneseq }
  0x2e   : > { %299 = vperm.xlu0 %460, %v294_v17  }
  0x35   : > { %305 = vperm.xlu1 %461, %v296_v18   ;;  %269 = vperm.xlu2 %462, %v258_v19  }
  0x36   : > { %230 = vperm.xlu0 %460, %v219_v20  }
  0x3e   : > { %308 = vperm.xlu0 %460, %v297_v21  }
  0x6f   : > { %v222_v22 = vpop.permute.xlu2 %221 }
  0x70   : > { %vm232_vm7 = vcmp.eq.s32.totalorder %v222_v22, 1 }
  0x71   : > { %v236_v54 = vsel %vm232_vm7, %v167_v31, 0.0 }
  0x77   : > { %v225_v23 = vpop.permute.xlu2 %224 }
  0x78   : > { %vm233_vm8 = vcmp.eq.s32.totalorder %v225_v23, 1  ;;  %v172_v23 = vshrl.u32 %v171_v15, 7 }
  0x79   : > { %v237_v55 = vsel %vm233_vm8, %v168_v32, 0.0 }
  0x7a   : > { %v240_v58 = vadd.f32 %v237_v55, %v236_v54 }
  0x7f   : > { %v228_v26 = vpop.permute.xlu2 %227 }
  0x80   : > { %vm234_vm10 = vcmp.eq.s32.totalorder %v228_v26, 1 }
  0x81   : > { %v238_v60 = vsel %vm234_vm10, %v169_v36, 0.0 }
  0x82   : > { %v241_v1 = vadd.f32 %v240_v58, %v238_v60 }
  0x87   : > { %v189_v24 = vpop.permute.xlu1 %188  ;;  %v267_v34 = vpop.permute.xlu2 %266 }
  0x88   : > { %v183_v25 = vpop.permute.xlu0 %182  ;;  %vm195_vm2 = vcmp.eq.s32.totalorder %v189_v24, 1  ;;  %vm273_vm6 = vcmp.eq.s32.totalorder %v267_v34, 1 }
  0x89   : > { %vm193_vm1 = vcmp.eq.s32.totalorder %v183_v25, 1  ;;  %v199_v42 = vsel %vm195_vm2, %v169_v36, 0.0  ;;  %v277_v53 = vsel %vm273_vm6, %v169_v36, 0.0  ;;  %vm288_vm2 = vcmp.eq.s32.totalorder %v172_v23, 2 }
  0x8a   : > { %v197_v37 = vsel %vm193_vm1, %v167_v31, 0.0  ;;  %vm249_vm1 = vcmp.eq.s32.totalorder %v172_v23, 1 }
  0x8f   : > { %v192_v27 = vpop.permute.xlu1 %191  ;;  %v270_v49 = vpop.permute.xlu2 %269 }
  0x90   : > { %v186_v30 = vpop.permute.xlu0 %185  ;;  %vm196_vm5 = vcmp.eq.s32.totalorder %v192_v27, 1  ;;  %vm274_vm9 = vcmp.eq.s32.totalorder %v270_v49, 1 }
  0x91   : > { %vm194_vm0 = vcmp.eq.s32.totalorder %v186_v30, 1  ;;  %v200_v48 = vsel %vm196_vm5, %v170_v43, 0.0  ;;  %v278_v59 = vsel %vm274_vm9, %v170_v43, 0.0 }
  0x92   : > { %v198_v35 = vsel %vm194_vm0, %v168_v32, 0.0  ;;  %vm210_vm0 = vcmp.eq.s32.totalorder %v172_v23, 0 }
  0x93   : > { %v201_v40 = vadd.f32 %v198_v35, %v197_v37  ;;  %v329_v37 = vld [vmem:[#allocation2] sm:$0xff] }
  0x95   : > { %v202_v46 = vadd.f32 %v201_v40, %v199_v42 }
  0x97   : > { %v264_v38 = vpop.permute.xlu1 %263  ;;  %v203_v51 = vadd.f32 %v202_v46, %v200_v48 }
  0x98   : > { %vm272_vm3 = vcmp.eq.s32.totalorder %v264_v38, 1  ;;  %v261_v41 = vpop.permute.xlu0 %260 }
  0x99   : > { %vm271_vm4 = vcmp.eq.s32.totalorder %v261_v41, 1  ;;  %v276_v44 = vsel %vm272_vm3, %v168_v32, 0.0  ;;  %v204_v57 = vrot.slane %v203_v51, 4  ;;  %vm327_vm3 = vcmp.eq.s32.totalorder %v172_v23, 3 }
  0x9a   : > { %v275_v45 = vsel %vm271_vm4, %v167_v31, 0.0 }
  0x9b   : > { %v279_v47 = vadd.f32 %v276_v44, %v275_v45  ;;  %v205_v62 = vadd.f32 %v204_v57, %v203_v51 }
  0x9d   : > { %v280_v56 = vadd.f32 %v279_v47, %v277_v53  ;;  %v206_v5 = vrot.slane %v205_v62, 2 }
  0x9f   : > { %v303_v50 = vpop.permute.xlu1 %302  ;;  %v281_v61 = vadd.f32 %v280_v56, %v278_v59  ;;  %v207_v13 = vadd.f32 %v206_v5, %v205_v62 }
  0xa0   : > { %v300_v52 = vpop.permute.xlu0 %299  ;;  %vm311_vm11 = vcmp.eq.s32.totalorder %v303_v50, 1 }
  0xa1   : > { %vm310_vm12 = vcmp.eq.s32.totalorder %v300_v52, 1  ;;  %v282_v2 = vrot.slane %v281_v61, 4  ;;  %v315_v6 = vsel %vm311_vm11, %v168_v32, 0.0  ;;  %v208_v22 = vrot.slane %v207_v13, 1 }
  0xa2   : > { %v314_v7 = vsel %vm310_vm12, %v167_v31, 0.0 }
  0xa3   : > { %v283_v9 = vadd.f32 %v282_v2, %v281_v61  ;;  %v318_v11 = vadd.f32 %v315_v6, %v314_v7  ;;  %v209_v28 = vadd.f32 %v208_v22, %v207_v13 }
  0xa5   : > { %v284_v18 = vrot.slane %v283_v9, 2  ;;  %v211_v33 = vsel %vm210_vm0, %v209_v28, 0.0 }
  0xa7   : > { %v306_v63 = vpop.permute.xlu1 %305  ;;  %v285_v26 = vadd.f32 %v284_v18, %v283_v9 }
  0xa8   : > { %v231_v0 = vpop.permute.xlu0 %230  ;;  %vm312_vm14 = vcmp.eq.s32.totalorder %v306_v63, 1 }
  0xa9   : > { %vm235_vm13 = vcmp.eq.s32.totalorder %v231_v0, 1  ;;  %v316_v10 = vsel %vm312_vm14, %v169_v36, 0.0  ;;  %v286_v31 = vrot.slane %v285_v26, 1 }
  0xaa   : > { %v239_v3 = vsel %vm235_vm13, %v170_v43, 0.0  ;;  %v319_v16 = vadd.f32 %v318_v11, %v316_v10 }
  0xab   : > { %v242_v4 = vadd.f32 %v241_v1, %v239_v3  ;;  %v287_v36 = vadd.f32 %v286_v31, %v285_v26 }
  0xad   : > { %v243_v8 = vrot.slane %v242_v4, 4 }
  0xaf   : > { %v244_v12 = vadd.f32 %v243_v8, %v242_v4 }
  0xb0   : > { %v309_v14 = vpop.permute.xlu0 %308 }
  0xb1   : > { %v245_v17 = vrot.slane %v244_v12, 2  ;;  %vm313_vm15 = vcmp.eq.s32.totalorder %v309_v14, 1 }
  0xb2   : > { %v317_v19 = vsel %vm313_vm15, %v170_v43, 0.0 }
  0xb3   : > { %v246_v20 = vadd.f32 %v245_v17, %v244_v12  ;;  %v320_v21 = vadd.f32 %v319_v16, %v317_v19 }
  0xb5   : > { %v247_v24 = vrot.slane %v246_v20, 1  ;;  %v321_v25 = vrot.slane %v320_v21, 4 }
  0xb7   : > { %v322_v27 = vadd.f32 %v321_v25, %v320_v21  ;;  %v248_v29 = vadd.f32 %v247_v24, %v246_v20 }
  0xb9   : > { %v323_v30 = vrot.slane %v322_v27, 2  ;;  %v250_v34 = vsel %vm249_vm1, %v248_v29, %v211_v33 }
  0xba   : > { %v289_v39 = vsel %vm288_vm2, %v287_v36, %v250_v34 }
  0xbb   : > { %v324_v32 = vadd.f32 %v323_v30, %v322_v27 }
  0xbd   : > { %v325_v35 = vrot.slane %v324_v32, 1 }
  0xbf   : > { %v326_v38 = vadd.f32 %v325_v35, %v324_v32 }
  0xc0   : > { %335 = sbr.rel (%p438_p5) target bundleno = 365 (0x16d), region = 36 }
  0xc1   : > { %v328_v40 = vsel %vm327_vm3, %v326_v38, %v289_v39 }
  0xc2   : > { %v330_v41 = vadd.f32 %v329_v37, %v328_v40 }
  0xc4   : > { %331 = vst [vmem:[#allocation2] sm:$0xff] %v330_v41 }
  0xcb   : > { %v336_v42 = vld [vmem:[#allocation2] sm:$0xff] }
  0xcc   : > { %463 = vrsqrt.f32 %v336_v42  ;;  %vm344_vm4 = vcmp.eq.f32.partialorder %v336_v42, inf  ;;  %v347_v49 = vand.u32 2147483648, %v336_v42  ;;  %vm346_vm5 = vcmp.eq.f32.partialorder %v336_v42, 0.0 }
  0xd2   : > { %v464_v43 = vpop.eup %463 }
  0xd3   : > { %v338_v44 = vmul.f32 %v464_v43, %v336_v42 }
  0xd5   : > { %v339_v45 = vmul.f32 %v464_v43, %v338_v44 }
  0xd7   : > { %v340_v46 = vmul.f32 0.5, %v339_v45 }
  0xd9   : > { %v341_v47 = vsub.f32 1.5, %v340_v46 }
  0xdb   : > { %v342_v48 = vmul.f32 %v464_v43, %v341_v47 }
  0xdd   : > { %v343_v50 = vmul.f32 %v342_v48, %v336_v42 }
  0xdf   : > { %v345_v51 = vsel %vm344_vm4, %v336_v42, %v343_v50 }
  0xe0   : > { %v348_v52 = vsel %vm346_vm5, %v347_v49, %v345_v51 }
  0xe1   : > { %349 = vadd.xlane.f32.xlu0 %v348_v52 }
 0x154   : > { %v350_v53 = vpop.xlane.xlu0 %349 }
 0x155   : > { %v351_v54 = vmul.f32 0.03125, %v350_v53 }
 0x157   : > { %v352_v55 = vadd.f32 1e-06, %v351_v54 }
 0x159   : > { %465 = vrcp.f32 %v352_v55  ;;  %v364_v59 = vand.u32 2147483648, %v352_v55  ;;  %v362_v61 = vand.u32 2147483647, %v352_v55  ;;  %vm358_vm7 = vweird.f32 %v352_v55 }
 0x15b   : > { %v365_v63 = vor.u32 1.1754944e-38, %v364_v59  ;;  %vm363_vm9 = vcmp.eq.f32.partialorder %v362_v61, 8.507059e+37 }
 0x15f   : > { %v466_v56 = vpop.eup %465 }
 0x160   : > { %v354_v57 = vmul.f32 %v466_v56, %v352_v55  ;;  %vm359_vm6 = vweird.f32 %v466_v56 }
 0x161   : > { %vm360_vm8 = vmor %vm358_vm7, %vm359_vm6 }
 0x162   : > { %v355_v58 = vsub.f32 1.0, %v354_v57 }
 0x164   : > { %v356_v60 = vmul.f32 %v466_v56, %v355_v58 }
 0x166   : > { %v357_v62 = vadd.f32 %v466_v56, %v356_v60 }
 0x168   : > { %v361_v0 = vsel %vm360_vm8, %v466_v56, %v357_v62 }
 0x169   : > { %v366_v1 = vsel %vm363_vm9, %v365_v63, %v361_v0 }
 0x16a   : > { %v367_v2 = vmul.f32 %v366_v1, %v348_v52 }
 0x16c   : > { %368 = vst [vmem:[#allocation2] sm:$0xff] %v367_v2 }
 0x16d PF: > { %p447_p6 = scmp.eq.s32.totalorder %s531_s10, 2  ;;  %s509_s19 = smov [#allocation2]  }
 0x16e   : > { %s375_s20 = sshll.u32 %s509_s19, 4  ;;  %s377_s23 = sshll.u32 %s559_s2, 4  ;;  %s376_s20 = int_to_ptr.vmem [resolvable:$true] %s375_s20  ;;  %s378_s23 = int_to_ptr.hbm [resolvable:$true] %s377_s23 }
 0x16f   : > { %444 = dma.vmem_to_hbm [thread:$0]  (%p447_p6), %s376_s20, 128, %s378_s23, [#allocation3]  }
 0x170   : > { %500 = dma.done.wait (%p447_p6), [#allocation3], 128  }
 0x171   : > { %502 = vsyncadd (%p447_p6), [#allocation3], 4294967168 }
 0x172 PF: > { %s13_s9 = sadd.s32 1, %s505_s9  }
 0x173   : > { %p10_p7 = scmp.ge.s32.totalorder %s13_s9, 5  }
 0x175   :  { %12 = sbr.rel (!%p10_p7) target bundleno = 1 (0x1), region = 66 }
 0x17a   :  { %391 = vsyncpa [#allocation3], 1 }
 0x17b   :  { %393 = vsyncpa [#allocation3 + $0x1], 1 }

</bundles_post_ra>
